<compile_context>
chip_gen: v7x
topology: tpu7x:2x2x1
jax: 0.10.0
libtpu: 0.0.40
codegen_flags: <defaults>
</compile_context>

<pallas_src>
import jax
import jax.numpy as jnp
import numpy as np
from jax.experimental import pallas as pl
from jax.experimental.pallas import tpu as pltpu

EPS = 1e-5


def resblock_kernel(x_ref, w1_ref, g1_ref, b1_ref, w2_ref, g2_ref, b2_ref,
                    proj_ref, o_ref):
    x = x_ref[...].astype(jnp.float32)            # (N, H, W*C)
    N, H, WC = x.shape
    nh = N * H
    proj = proj_ref[...]                          # (WC, WC) f32, pre-scaled by 1/(N*H*W)

    def bn_relu(v, g, b):
        flat = v.reshape(nh, WC)
        # per-channel mean, broadcast back to every lane of that channel (MXU)
        mean_l = jnp.dot(jnp.sum(flat, axis=0, keepdims=True), proj,
                         preferred_element_type=jnp.float32)          # (1, WC)
        cent = flat - mean_l
        # centered (two-pass) biased variance, again via the channel projector
        var_l = jnp.dot(jnp.sum(cent * cent, axis=0, keepdims=True), proj,
                        preferred_element_type=jnp.float32)           # (1, WC)
        y = cent * (jax.lax.rsqrt(var_l + EPS) * g) + b
        return jnp.maximum(y, 0.0).reshape(N, H, WC)

    def conv3x3(v, w_ref):
        # circular 3x3 conv: 3 accumulated bf16 matmuls, one per H-tap.
        # w_ref: (3, WC, WC) bf16 block-circulant-in-W weights.
        up = jnp.roll(v, 1, axis=1).reshape(nh, WC).astype(jnp.bfloat16)    # dh=0
        mid = v.reshape(nh, WC).astype(jnp.bfloat16)                        # dh=1
        dn = jnp.roll(v, -1, axis=1).reshape(nh, WC).astype(jnp.bfloat16)   # dh=2
        out = jnp.dot(up, w_ref[0], preferred_element_type=jnp.float32)
        out = out + jnp.dot(mid, w_ref[1], preferred_element_type=jnp.float32)
        out = out + jnp.dot(dn, w_ref[2], preferred_element_type=jnp.float32)
        return out.reshape(N, H, WC)

    h = bn_relu(x, g1_ref[...], b1_ref[...])
    h = conv3x3(h, w1_ref)
    h = bn_relu(h, g2_ref[...], b2_ref[...])
    h = conv3x3(h, w2_ref)
    o_ref[...] = (h + x).astype(o_ref.dtype)


def _pack_conv_weight(w, W):
    """PyTorch (Cout, Cin, 3, 3) -> (3, W*Cin, W*Cout) per-dh block-circulant-in-W
    matrices (bf16).  Row index = jw*Cin + ci with jw = (j + dw - 1) % W
    (circular padding of 1 in W); col index = j*Cout + co."""
    w_np = np.asarray(jax.device_get(w)).astype(np.float32)   # (Cout, Cin, 3, 3)
    Cout, Cin, KH, KW = w_np.shape
    assert KH == 3 and KW == 3, "packing assumes a 3x3 kernel with circular pad 1"
    mat = np.zeros((KH, W * Cin, W * Cout), np.float32)
    for dh in range(KH):
        for dw in range(KW):
            blk = w_np[:, :, dh, dw].T                         # (Cin, Cout)
            for j in range(W):
                jw = (j + dw - 1) % W
                mat[dh, jw * Cin:(jw + 1) * Cin, j * Cout:(j + 1) * Cout] += blk
    return jnp.asarray(mat, dtype=jnp.bfloat16)


def _channel_projector(W, C, count):
    """(W*C, W*C) matrix: proj[a, b] = 1/count if a % C == b % C else 0."""
    lanes = np.arange(W * C)
    proj = (lanes[:, None] % C == lanes[None, :] % C).astype(np.float32) / float(count)
    return jnp.asarray(proj)


def resblock_lane(x3, w1m, g1l, b1l, w2m, g2l, b2l, proj):
    """Lane-dense entry point: x3 is (N, H, W*C) float32."""
    N, H, WC = x3.shape

    def full(shape):
        ndim = len(shape)
        return pl.BlockSpec(shape, lambda i, _n=ndim: (0,) * _n)

    return pl.pallas_call(
        resblock_kernel,
        out_shape=jax.ShapeDtypeStruct((N, H, WC), x3.dtype),
        grid=(1,),
        in_specs=[full(x3.shape),
                  full(w1m.shape), full(g1l.shape), full(b1l.shape),
                  full(w2m.shape), full(g2l.shape), full(b2l.shape),
                  full(proj.shape)],
        out_specs=full((N, H, WC)),
        # x is fully loaded before o_ref is written -> safe to reuse its HBM buffer.
        input_output_aliases={0: 0},
        compiler_params=pltpu.CompilerParams(
            dimension_semantics=("arbitrary",),
            vmem_limit_bytes=32 * 1024 * 1024),
    )(x3, w1m, g1l, b1l, w2m, g2l, b2l, proj)


@jax.jit
def _resblock_nchw_jit(x_nchw, w1m, gamma1, beta1, w2m, gamma2, beta2, proj):
    N, C, H, W = x_nchw.shape
    WC = W * C
    # NCHW -> (N, H, W*C): channel fastest within each W column (lane = w*C + c).
    x3 = jnp.transpose(x_nchw, (0, 2, 3, 1)).reshape(N, H, WC).astype(jnp.float32)
    g1l = jnp.tile(gamma1.astype(jnp.float32), W).reshape(1, WC)
    b1l = jnp.tile(beta1.astype(jnp.float32), W).reshape(1, WC)
    g2l = jnp.tile(gamma2.astype(jnp.float32), W).reshape(1, WC)
    b2l = jnp.tile(beta2.astype(jnp.float32), W).reshape(1, WC)
    out3 = resblock_lane(x3, w1m, g1l, b1l, w2m, g2l, b2l, proj)
    return jnp.transpose(out3.reshape(N, H, W, C), (0, 3, 1, 2)).astype(x_nchw.dtype)


def tiled_res_block(x_nchw, w1, gamma1, beta1, w2, gamma2, beta2):
    """x_nchw: (N, C, H, W) float32 (PyTorch layout). Returns the same shape."""
    N, C, H, W = x_nchw.shape
    w1m = _pack_conv_weight(w1, W)
    w2m = _pack_conv_weight(w2, W)
    proj = _channel_projector(W, C, N * H * W)
    return _resblock_nchw_jit(x_nchw, w1m, gamma1, beta1, w2m, gamma2, beta2, proj)


def _reference(x, w1, g1, b1, w2, g2, b2, conv_in_dtype=jnp.float32):
    """Pure-JAX reference of the PyTorch module (training-mode BN forward).

    conv_in_dtype=jnp.bfloat16 emulates the kernel's bf16 MXU operands (f32 accum)
    for a tight structural-correctness check."""
    def bn_relu(v, g, b):
        mean = jnp.mean(v, axis=(0, 2, 3), keepdims=True)
        var = jnp.mean((v - mean) ** 2, axis=(0, 2, 3), keepdims=True)
        y = (v - mean) * jax.lax.rsqrt(var + EPS) * g.reshape(1, -1, 1, 1) \
            + b.reshape(1, -1, 1, 1)
        return jnp.maximum(y, 0.0)

    def conv(v, w):
        v = v.astype(conv_in_dtype).astype(jnp.float32)
        wc = w.astype(conv_in_dtype).astype(jnp.float32)
        vp = jnp.pad(v, ((0, 0), (0, 0), (1, 1), (1, 1)), mode="wrap")
        return jax.lax.conv_general_dilated(
            vp, wc, (1, 1), "VALID", dimension_numbers=("NCHW", "OIHW", "NCHW"),
            precision=jax.lax.Precision.HIGHEST)

    h = conv(bn_relu(x, g1, b1), w1)
    h = conv(bn_relu(h, g2, b2), w2)
    return h + x


if __name__ == "__main__":
    features, N, H, W = 8, 2, 16, 16          # W * C = 128 -> exactly one lane tile

    key = jax.random.PRNGKey(0)
    k = jax.random.split(key, 7)

    x = jax.random.normal(k[0], (N, features, H, W), jnp.float32)
    bound = 1.0 / np.sqrt(features * 9)
    w1 = jax.random.uniform(k[1], (features, features, 3, 3), jnp.float32, -bound, bound)
    w2 = jax.random.uniform(k[2], (features, features, 3, 3), jnp.float32, -bound, bound)
    gamma1 = 1.0 + 0.05 * jax.random.normal(k[3], (features,), jnp.float32)
    beta1 = 0.05 * jax.random.normal(k[4], (features,), jnp.float32)
    gamma2 = 1.0 + 0.05 * jax.random.normal(k[5], (features,), jnp.float32)
    beta2 = 0.05 * jax.random.normal(k[6], (features,), jnp.float32)

    out = tiled_res_block(x, w1, gamma1, beta1, w2, gamma2, beta2)
    out = jax.block_until_ready(out)

    assert out.shape == x.shape
    assert bool(jnp.all(jnp.isfinite(out)))

    # 1) Structural correctness: tight tolerance vs a bf16-conv-matched reference.
    ref_bf16 = jax.block_until_ready(
        _reference(x, w1, gamma1, beta1, w2, gamma2, beta2,
                   conv_in_dtype=jnp.bfloat16))
    err_m = float(jnp.max(jnp.abs(out - ref_bf16)))
    assert err_m < 5e-3, f"kernel/bf16-matched-reference mismatch, max abs err = {err_m}"

    # 2) Precision sanity: loose tolerance vs the full-f32 reference (bf16 MXU operands).
    ref_f32 = jax.block_until_ready(
        _reference(x, w1, gamma1, beta1, w2, gamma2, beta2))
    err_f = float(jnp.max(jnp.abs(out - ref_f32)))
    assert err_f < 5e-2, f"kernel/f32-reference mismatch, max abs err = {err_f}"

    print("KERNEL_OK")
</pallas_src>

<mosaic_0001>
module attributes {stable_mosaic.version = 11 : i64} {
  func.func @resblock_kernel(%arg0: i32, %arg1: memref<2x16x128xf32, #tpu.memory_space<vmem>>, %arg2: memref<3x128x128xbf16, #tpu.memory_space<vmem>>, %arg3: memref<1x128xf32, #tpu.memory_space<vmem>>, %arg4: memref<1x128xf32, #tpu.memory_space<vmem>>, %arg5: memref<3x128x128xbf16, #tpu.memory_space<vmem>>, %arg6: memref<1x128xf32, #tpu.memory_space<vmem>>, %arg7: memref<1x128xf32, #tpu.memory_space<vmem>>, %arg8: memref<128x128xf32, #tpu.memory_space<vmem>>, %arg9: memref<2x16x128xf32, #tpu.memory_space<vmem>>) attributes {dimension_semantics = [#tpu.dimension_semantics<arbitrary>], iteration_bounds = array<i64: 1>, scalar_prefetch = 0 : i64, scratch_operands = 0 : i64, tpu.core_type = #tpu.core_type<tc>, window_params = [{pipeline_mode = #tpu.pipeline_mode<synchronous>, transform_indices = @transform_0, window_bounds = array<i64: 2, 16, 128>}, {pipeline_mode = #tpu.pipeline_mode<synchronous>, transform_indices = @transform_1, window_bounds = array<i64: 3, 128, 128>}, {pipeline_mode = #tpu.pipeline_mode<synchronous>, transform_indices = @transform_2, window_bounds = array<i64: 1, 128>}, {pipeline_mode = #tpu.pipeline_mode<synchronous>, transform_indices = @transform_3, window_bounds = array<i64: 1, 128>}, {pipeline_mode = #tpu.pipeline_mode<synchronous>, transform_indices = @transform_4, window_bounds = array<i64: 3, 128, 128>}, {pipeline_mode = #tpu.pipeline_mode<synchronous>, transform_indices = @transform_5, window_bounds = array<i64: 1, 128>}, {pipeline_mode = #tpu.pipeline_mode<synchronous>, transform_indices = @transform_6, window_bounds = array<i64: 1, 128>}, {pipeline_mode = #tpu.pipeline_mode<synchronous>, transform_indices = @transform_7, window_bounds = array<i64: 128, 128>}, {pipeline_mode = #tpu.pipeline_mode<synchronous>, transform_indices = @transform_8, window_bounds = array<i64: 2, 16, 128>}]} {
    %c0 = arith.constant 0 : index
    %c0_0 = arith.constant 0 : index
    %c0_1 = arith.constant 0 : index
    %0 = vector.load %arg1[%c0, %c0_0, %c0_1] : memref<2x16x128xf32, #tpu.memory_space<vmem>>, vector<2x16x128xf32>
    %c0_2 = arith.constant 0 : index
    %c0_3 = arith.constant 0 : index
    %1 = vector.load %arg8[%c0_2, %c0_3] : memref<128x128xf32, #tpu.memory_space<vmem>>, vector<128x128xf32>
    %c0_4 = arith.constant 0 : index
    %c0_5 = arith.constant 0 : index
    %2 = vector.load %arg3[%c0_4, %c0_5] : memref<1x128xf32, #tpu.memory_space<vmem>>, vector<1x128xf32>
    %c0_6 = arith.constant 0 : index
    %c0_7 = arith.constant 0 : index
    %3 = vector.load %arg4[%c0_6, %c0_7] : memref<1x128xf32, #tpu.memory_space<vmem>>, vector<1x128xf32>
    %4 = vector.shape_cast %0 : vector<2x16x128xf32> to vector<32x128xf32>
    %cst = arith.constant dense<0.000000e+00> : vector<128xf32>
    %5 = vector.multi_reduction <add>, %4, %cst [0] : vector<32x128xf32> to vector<128xf32>
    %6 = vector.shape_cast %5 : vector<128xf32> to vector<1x128xf32>
    %cst_8 = arith.constant dense<0.000000e+00> : vector<1x128xf32>
    %7 = tpu.matmul %6, %1, %cst_8 {dimension_numbers = #tpu.dot_dimension_numbers<[1], [0], [0], [1], [0, 0, 1, 1], [], []>} : vector<1x128xf32>, vector<128x128xf32>, vector<1x128xf32> -> vector<1x128xf32>
    %8 = vector.broadcast %7 : vector<1x128xf32> to vector<32x128xf32>
    %9 = arith.subf %4, %8 : vector<32x128xf32>
    %10 = arith.mulf %9, %9 : vector<32x128xf32>
    %cst_9 = arith.constant dense<0.000000e+00> : vector<128xf32>
    %11 = vector.multi_reduction <add>, %10, %cst_9 [0] : vector<32x128xf32> to vector<128xf32>
    %12 = vector.shape_cast %11 : vector<128xf32> to vector<1x128xf32>
    %cst_10 = arith.constant dense<0.000000e+00> : vector<1x128xf32>
    %13 = tpu.matmul %12, %1, %cst_10 {dimension_numbers = #tpu.dot_dimension_numbers<[1], [0], [0], [1], [0, 0, 1, 1], [], []>} : vector<1x128xf32>, vector<128x128xf32>, vector<1x128xf32> -> vector<1x128xf32>
    %cst_11 = arith.constant 9.99999974E-6 : f32
    %14 = vector.broadcast %cst_11 : f32 to vector<1x128xf32>
    %15 = arith.addf %13, %14 : vector<1x128xf32>
    %16 = math.rsqrt %15 : vector<1x128xf32>
    %17 = arith.mulf %16, %2 : vector<1x128xf32>
    %18 = vector.broadcast %17 : vector<1x128xf32> to vector<32x128xf32>
    %19 = arith.mulf %9, %18 : vector<32x128xf32>
    %20 = vector.broadcast %3 : vector<1x128xf32> to vector<32x128xf32>
    %21 = arith.addf %19, %20 : vector<32x128xf32>
    %cst_12 = arith.constant 0.000000e+00 : f32
    %22 = vector.broadcast %cst_12 : f32 to vector<32x128xf32>
    %23 = arith.maximumf %21, %22 : vector<32x128xf32>
    %24 = vector.shape_cast %23 : vector<32x128xf32> to vector<2x16x128xf32>
    %25 = vector.extract_strided_slice %24 {offsets = [0, 15, 0], sizes = [2, 1, 128], strides = [1, 1, 1]} : vector<2x16x128xf32> to vector<2x1x128xf32>
    %26 = vector.extract_strided_slice %24 {offsets = [0, 0, 0], sizes = [2, 15, 128], strides = [1, 1, 1]} : vector<2x16x128xf32> to vector<2x15x128xf32>
    %27 = tpu.concatenate %25, %26 in 1 : vector<2x1x128xf32>, vector<2x15x128xf32> -> vector<2x16x128xf32>
    %28 = vector.shape_cast %27 : vector<2x16x128xf32> to vector<32x128xf32>
    %29 = arith.truncf %28 : vector<32x128xf32> to vector<32x128xbf16>
    %30 = vector.shape_cast %24 : vector<2x16x128xf32> to vector<32x128xf32>
    %31 = arith.truncf %30 : vector<32x128xf32> to vector<32x128xbf16>
    %32 = vector.extract_strided_slice %24 {offsets = [0, 1, 0], sizes = [2, 15, 128], strides = [1, 1, 1]} : vector<2x16x128xf32> to vector<2x15x128xf32>
    %33 = vector.extract_strided_slice %24 {offsets = [0, 0, 0], sizes = [2, 1, 128], strides = [1, 1, 1]} : vector<2x16x128xf32> to vector<2x1x128xf32>
    %34 = tpu.concatenate %32, %33 in 1 : vector<2x15x128xf32>, vector<2x1x128xf32> -> vector<2x16x128xf32>
    %35 = vector.shape_cast %34 : vector<2x16x128xf32> to vector<32x128xf32>
    %36 = arith.truncf %35 : vector<32x128xf32> to vector<32x128xbf16>
    %c0_13 = arith.constant 0 : index
    %c0_14 = arith.constant 0 : index
    %c0_15 = arith.constant 0 : index
    %37 = vector.load %arg2[%c0_13, %c0_14, %c0_15] : memref<3x128x128xbf16, #tpu.memory_space<vmem>>, vector<1x128x128xbf16>
    %38 = vector.shape_cast %37 : vector<1x128x128xbf16> to vector<128x128xbf16>
    %cst_16 = arith.constant dense<0.000000e+00> : vector<32x128xf32>
    %39 = tpu.matmul %29, %38, %cst_16 {dimension_numbers = #tpu.dot_dimension_numbers<[1], [0], [0], [1], [0, 0, 1, 1], [], []>} : vector<32x128xbf16>, vector<128x128xbf16>, vector<32x128xf32> -> vector<32x128xf32>
    %c1 = arith.constant 1 : index
    %c0_17 = arith.constant 0 : index
    %c0_18 = arith.constant 0 : index
    %40 = vector.load %arg2[%c1, %c0_17, %c0_18] : memref<3x128x128xbf16, #tpu.memory_space<vmem>>, vector<1x128x128xbf16>
    %41 = vector.shape_cast %40 : vector<1x128x128xbf16> to vector<128x128xbf16>
    %cst_19 = arith.constant dense<0.000000e+00> : vector<32x128xf32>
    %42 = tpu.matmul %31, %41, %cst_19 {dimension_numbers = #tpu.dot_dimension_numbers<[1], [0], [0], [1], [0, 0, 1, 1], [], []>} : vector<32x128xbf16>, vector<128x128xbf16>, vector<32x128xf32> -> vector<32x128xf32>
    %43 = arith.addf %39, %42 : vector<32x128xf32>
    %c2 = arith.constant 2 : index
    %c0_20 = arith.constant 0 : index
    %c0_21 = arith.constant 0 : index
    %44 = vector.load %arg2[%c2, %c0_20, %c0_21] : memref<3x128x128xbf16, #tpu.memory_space<vmem>>, vector<1x128x128xbf16>
    %45 = vector.shape_cast %44 : vector<1x128x128xbf16> to vector<128x128xbf16>
    %cst_22 = arith.constant dense<0.000000e+00> : vector<32x128xf32>
    %46 = tpu.matmul %36, %45, %cst_22 {dimension_numbers = #tpu.dot_dimension_numbers<[1], [0], [0], [1], [0, 0, 1, 1], [], []>} : vector<32x128xbf16>, vector<128x128xbf16>, vector<32x128xf32> -> vector<32x128xf32>
    %47 = arith.addf %43, %46 : vector<32x128xf32>
    %48 = vector.shape_cast %47 : vector<32x128xf32> to vector<2x16x128xf32>
    %c0_23 = arith.constant 0 : index
    %c0_24 = arith.constant 0 : index
    %49 = vector.load %arg6[%c0_23, %c0_24] : memref<1x128xf32, #tpu.memory_space<vmem>>, vector<1x128xf32>
    %c0_25 = arith.constant 0 : index
    %c0_26 = arith.constant 0 : index
    %50 = vector.load %arg7[%c0_25, %c0_26] : memref<1x128xf32, #tpu.memory_space<vmem>>, vector<1x128xf32>
    %51 = vector.shape_cast %48 : vector<2x16x128xf32> to vector<32x128xf32>
    %cst_27 = arith.constant dense<0.000000e+00> : vector<128xf32>
    %52 = vector.multi_reduction <add>, %51, %cst_27 [0] : vector<32x128xf32> to vector<128xf32>
    %53 = vector.shape_cast %52 : vector<128xf32> to vector<1x128xf32>
    %cst_28 = arith.constant dense<0.000000e+00> : vector<1x128xf32>
    %54 = tpu.matmul %53, %1, %cst_28 {dimension_numbers = #tpu.dot_dimension_numbers<[1], [0], [0], [1], [0, 0, 1, 1], [], []>} : vector<1x128xf32>, vector<128x128xf32>, vector<1x128xf32> -> vector<1x128xf32>
    %55 = vector.broadcast %54 : vector<1x128xf32> to vector<32x128xf32>
    %56 = arith.subf %51, %55 : vector<32x128xf32>
    %57 = arith.mulf %56, %56 : vector<32x128xf32>
    %cst_29 = arith.constant dense<0.000000e+00> : vector<128xf32>
    %58 = vector.multi_reduction <add>, %57, %cst_29 [0] : vector<32x128xf32> to vector<128xf32>
    %59 = vector.shape_cast %58 : vector<128xf32> to vector<1x128xf32>
    %cst_30 = arith.constant dense<0.000000e+00> : vector<1x128xf32>
    %60 = tpu.matmul %59, %1, %cst_30 {dimension_numbers = #tpu.dot_dimension_numbers<[1], [0], [0], [1], [0, 0, 1, 1], [], []>} : vector<1x128xf32>, vector<128x128xf32>, vector<1x128xf32> -> vector<1x128xf32>
    %cst_31 = arith.constant 9.99999974E-6 : f32
    %61 = vector.broadcast %cst_31 : f32 to vector<1x128xf32>
    %62 = arith.addf %60, %61 : vector<1x128xf32>
    %63 = math.rsqrt %62 : vector<1x128xf32>
    %64 = arith.mulf %63, %49 : vector<1x128xf32>
    %65 = vector.broadcast %64 : vector<1x128xf32> to vector<32x128xf32>
    %66 = arith.mulf %56, %65 : vector<32x128xf32>
    %67 = vector.broadcast %50 : vector<1x128xf32> to vector<32x128xf32>
    %68 = arith.addf %66, %67 : vector<32x128xf32>
    %cst_32 = arith.constant 0.000000e+00 : f32
    %69 = vector.broadcast %cst_32 : f32 to vector<32x128xf32>
    %70 = arith.maximumf %68, %69 : vector<32x128xf32>
    %71 = vector.shape_cast %70 : vector<32x128xf32> to vector<2x16x128xf32>
    %72 = vector.extract_strided_slice %71 {offsets = [0, 15, 0], sizes = [2, 1, 128], strides = [1, 1, 1]} : vector<2x16x128xf32> to vector<2x1x128xf32>
    %73 = vector.extract_strided_slice %71 {offsets = [0, 0, 0], sizes = [2, 15, 128], strides = [1, 1, 1]} : vector<2x16x128xf32> to vector<2x15x128xf32>
    %74 = tpu.concatenate %72, %73 in 1 : vector<2x1x128xf32>, vector<2x15x128xf32> -> vector<2x16x128xf32>
    %75 = vector.shape_cast %74 : vector<2x16x128xf32> to vector<32x128xf32>
    %76 = arith.truncf %75 : vector<32x128xf32> to vector<32x128xbf16>
    %77 = vector.shape_cast %71 : vector<2x16x128xf32> to vector<32x128xf32>
    %78 = arith.truncf %77 : vector<32x128xf32> to vector<32x128xbf16>
    %79 = vector.extract_strided_slice %71 {offsets = [0, 1, 0], sizes = [2, 15, 128], strides = [1, 1, 1]} : vector<2x16x128xf32> to vector<2x15x128xf32>
    %80 = vector.extract_strided_slice %71 {offsets = [0, 0, 0], sizes = [2, 1, 128], strides = [1, 1, 1]} : vector<2x16x128xf32> to vector<2x1x128xf32>
    %81 = tpu.concatenate %79, %80 in 1 : vector<2x15x128xf32>, vector<2x1x128xf32> -> vector<2x16x128xf32>
    %82 = vector.shape_cast %81 : vector<2x16x128xf32> to vector<32x128xf32>
    %83 = arith.truncf %82 : vector<32x128xf32> to vector<32x128xbf16>
    %c0_33 = arith.constant 0 : index
    %c0_34 = arith.constant 0 : index
    %c0_35 = arith.constant 0 : index
    %84 = vector.load %arg5[%c0_33, %c0_34, %c0_35] : memref<3x128x128xbf16, #tpu.memory_space<vmem>>, vector<1x128x128xbf16>
    %85 = vector.shape_cast %84 : vector<1x128x128xbf16> to vector<128x128xbf16>
    %cst_36 = arith.constant dense<0.000000e+00> : vector<32x128xf32>
    %86 = tpu.matmul %76, %85, %cst_36 {dimension_numbers = #tpu.dot_dimension_numbers<[1], [0], [0], [1], [0, 0, 1, 1], [], []>} : vector<32x128xbf16>, vector<128x128xbf16>, vector<32x128xf32> -> vector<32x128xf32>
    %c1_37 = arith.constant 1 : index
    %c0_38 = arith.constant 0 : index
    %c0_39 = arith.constant 0 : index
    %87 = vector.load %arg5[%c1_37, %c0_38, %c0_39] : memref<3x128x128xbf16, #tpu.memory_space<vmem>>, vector<1x128x128xbf16>
    %88 = vector.shape_cast %87 : vector<1x128x128xbf16> to vector<128x128xbf16>
    %cst_40 = arith.constant dense<0.000000e+00> : vector<32x128xf32>
    %89 = tpu.matmul %78, %88, %cst_40 {dimension_numbers = #tpu.dot_dimension_numbers<[1], [0], [0], [1], [0, 0, 1, 1], [], []>} : vector<32x128xbf16>, vector<128x128xbf16>, vector<32x128xf32> -> vector<32x128xf32>
    %90 = arith.addf %86, %89 : vector<32x128xf32>
    %c2_41 = arith.constant 2 : index
    %c0_42 = arith.constant 0 : index
    %c0_43 = arith.constant 0 : index
    %91 = vector.load %arg5[%c2_41, %c0_42, %c0_43] : memref<3x128x128xbf16, #tpu.memory_space<vmem>>, vector<1x128x128xbf16>
    %92 = vector.shape_cast %91 : vector<1x128x128xbf16> to vector<128x128xbf16>
    %cst_44 = arith.constant dense<0.000000e+00> : vector<32x128xf32>
    %93 = tpu.matmul %83, %92, %cst_44 {dimension_numbers = #tpu.dot_dimension_numbers<[1], [0], [0], [1], [0, 0, 1, 1], [], []>} : vector<32x128xbf16>, vector<128x128xbf16>, vector<32x128xf32> -> vector<32x128xf32>
    %94 = arith.addf %90, %93 : vector<32x128xf32>
    %95 = vector.shape_cast %94 : vector<32x128xf32> to vector<2x16x128xf32>
    %96 = arith.addf %95, %0 : vector<2x16x128xf32>
    %c0_45 = arith.constant 0 : index
    %c0_46 = arith.constant 0 : index
    %c0_47 = arith.constant 0 : index
    %97 = vector.load %arg9[%c0_45, %c0_46, %c0_47] : memref<2x16x128xf32, #tpu.memory_space<vmem>>, vector<2x16x128xf32>
    tpu.vector_store %arg9[%c0_45, %c0_46, %c0_47], %96 {strides = array<i32>} : memref<2x16x128xf32, #tpu.memory_space<vmem>>, vector<2x16x128xf32>,
    return
  }
  func.func @transform_0(%arg0: i32) -> (i32, i32, i32) {
    %c0_i32 = arith.constant 0 : i32
    %c0_i32_0 = arith.constant 0 : i32
    %c0_i32_1 = arith.constant 0 : i32
    %c0_i32_2 = arith.constant 0 : i32
    return %c0_i32, %c0_i32_0, %c0_i32_1 : i32, i32, i32
  }
  func.func @transform_1(%arg0: i32) -> (i32, i32, i32) {
    %c0_i32 = arith.constant 0 : i32
    %c0_i32_0 = arith.constant 0 : i32
    %c0_i32_1 = arith.constant 0 : i32
    %c0_i32_2 = arith.constant 0 : i32
    return %c0_i32, %c0_i32_0, %c0_i32_1 : i32, i32, i32
  }
  func.func @transform_2(%arg0: i32) -> (i32, i32) {
    %c0_i32 = arith.constant 0 : i32
    %c0_i32_0 = arith.constant 0 : i32
    %c0_i32_1 = arith.constant 0 : i32
    return %c0_i32, %c0_i32_0 : i32, i32
  }
  func.func @transform_3(%arg0: i32) -> (i32, i32) {
    %c0_i32 = arith.constant 0 : i32
    %c0_i32_0 = arith.constant 0 : i32
    %c0_i32_1 = arith.constant 0 : i32
    return %c0_i32, %c0_i32_0 : i32, i32
  }
  func.func @transform_4(%arg0: i32) -> (i32, i32, i32) {
    %c0_i32 = arith.constant 0 : i32
    %c0_i32_0 = arith.constant 0 : i32
    %c0_i32_1 = arith.constant 0 : i32
    %c0_i32_2 = arith.constant 0 : i32
    return %c0_i32, %c0_i32_0, %c0_i32_1 : i32, i32, i32
  }
  func.func @transform_5(%arg0: i32) -> (i32, i32) {
    %c0_i32 = arith.constant 0 : i32
    %c0_i32_0 = arith.constant 0 : i32
    %c0_i32_1 = arith.constant 0 : i32
    return %c0_i32, %c0_i32_0 : i32, i32
  }
  func.func @transform_6(%arg0: i32) -> (i32, i32) {
    %c0_i32 = arith.constant 0 : i32
    %c0_i32_0 = arith.constant 0 : i32
    %c0_i32_1 = arith.constant 0 : i32
    return %c0_i32, %c0_i32_0 : i32, i32
  }
  func.func @transform_7(%arg0: i32) -> (i32, i32) {
    %c0_i32 = arith.constant 0 : i32
    %c0_i32_0 = arith.constant 0 : i32
    %c0_i32_1 = arith.constant 0 : i32
    return %c0_i32, %c0_i32_0 : i32, i32
  }
  func.func @transform_8(%arg0: i32) -> (i32, i32, i32) {
    %c0_i32 = arith.constant 0 : i32
    %c0_i32_0 = arith.constant 0 : i32
    %c0_i32_1 = arith.constant 0 : i32
    %c0_i32_2 = arith.constant 0 : i32
    return %c0_i32, %c0_i32_0, %c0_i32_1 : i32, i32, i32
  }
}

</mosaic_0001>

<bundles_post_ra>
// kernel: tile.23
= control target key start
LH: loop header
LB: loop body
LE: loop exit
PB: predicated region body
PF: predicated region fallthrough
CT: control target
= control target key end

     0   :  { %s28_s0 = inlined_call_operand.vmem [shape: f32[8], index: 0, kind: input, shape index: {}]   ;;  %s29_s1 = inlined_call_operand.vmem [shape: f32[16,8], index: 1, kind: output, shape index: {}]  }
   0x1   :  { %v4_v0 = vld [vmem:[%s28_s0] ss:$0 sm:$0xff] }
   0x2   :  { %5 = vst [vmem:[%s29_s1] sm:$0xff] %v4_v0  ;;  %8 = vst [vmem:[%s29_s1 + $0x8] sm:$0xff] %v4_v0 }

// kernel: tile.24
= control target key start
LH: loop header
LB: loop body
LE: loop exit
PB: predicated region body
PF: predicated region fallthrough
CT: control target
= control target key end

     0   :  { %s131_s10 = smov 120   ;;  %s132_s11 = smov 104   ;;  %vm3_vm0 = vcmask 64512   ;;  %vm9_vm1 = vcmask 1048512   ;;  %vm15_vm2 = vcmask 982912   ;;  %vm21_vm3 = vcmask 917312   ;;  %s207_s0 = inlined_call_operand.vmem [shape: f32[16,8], index: 0, kind: input, shape index: {}]   ;;  %s208_s1 = inlined_call_operand.vmem [shape: f32[1,128], index: 1, kind: output, shape index: {}]  }
   0x1   :  { %v101_v0 = vld [vmem:[%s207_s0 + $0xf] sm:$0x1]   ;;  %v103_v1 = vld [vmem:[%s207_s0 + $0xd] sm:$0x1]   ;;  %v102_v2 = vld [vmem:[%s207_s0 + $0xe] sm:$0x1]  }
   0x2   :  { %7 = vrot.lane.b32.xlu0 %v101_v0, %s131_s10  ;;  %19 = vrot.lane.b32.xlu1 %v103_v1, %s132_s11  ;;  %v104_v3 = vld [vmem:[%s207_s0 + $0xc] sm:$0x1]   ;;  %s133_s16 = smov 112   ;;  %s134_s17 = smov 96   ;;  %v105_v4 = vld [vmem:[%s207_s0 + $0xb] sm:$0x1]  }
   0x3   :  { %v106_v5 = vld [vmem:[%s207_s0 + $0xa] sm:$0x1]   ;;  %v2_v6 = vld [vmem:[%s207_s0] sm:$0x1]   ;;  %s135_s24 = smov 88   ;;  %s136_s25 = smov 80  }
   0x4   :  { %4 = vst.msk [vmem:[#allocation0] sm:$0x1] %vm3_vm0, %v2_v6   ;;  %v107_v7 = vld [vmem:[%s207_s0 + $0x9] sm:$0x1]   ;;  %v108_v8 = vld [vmem:[%s207_s0 + $0x8] sm:$0x1]  }
   0x5   :  { %s137_s30 = smov 72   ;;  %s138_s2 = smov 64   ;;  %v109_v9 = vld [vmem:[%s207_s0 + $0x7] sm:$0x1]   ;;  %v110_v10 = vld [vmem:[%s207_s0 + $0x6] sm:$0x1]  }
   0x6   :  { %13 = vrot.lane.b32.xlu0 %v102_v2, %s133_s16  ;;  %25 = vrot.lane.b32.xlu1 %v104_v3, %s134_s17  ;;  %s139_s7 = smov 56   ;;  %s140_s8 = smov 48   ;;  %v111_v11 = vld [vmem:[%s207_s0 + $0x5] sm:$0x1]   ;;  %v112_v12 = vld [vmem:[%s207_s0 + $0x4] sm:$0x1]  }
   0x7   :  { %s141_s13 = smov 40   ;;  %s142_s14 = smov 32   ;;  %v113_v13 = vld [vmem:[%s207_s0 + $0x3] sm:$0x1]   ;;  %v114_v14 = vld [vmem:[%s207_s0 + $0x2] sm:$0x1]  }
   0x8   :  { %s143_s19 = smov 24   ;;  %s144_s20 = smov 16   ;;  %v115_v15 = vld [vmem:[%s207_s0 + $0x1] sm:$0x1]   ;;  %vm27_vm4 = vcmask 851712   ;;  %vm33_vm5 = vcmask 786112  }
   0x9   :  { %s145_s0 = smov 8   ;;  %vm39_vm6 = vcmask 720512   ;;  %vm45_vm7 = vcmask 654912   ;;  %vm51_vm8 = vcmask 589312   ;;  %vm57_vm9 = vcmask 523712  }
   0xa   :  { %31 = vrot.lane.b32.xlu0 %v105_v4, %s135_s24  ;;  %37 = vrot.lane.b32.xlu1 %v106_v5, %s136_s25  ;;  %vm63_vm10 = vcmask 458112   ;;  %vm69_vm11 = vcmask 392512   ;;  %vm75_vm12 = vcmask 326912   ;;  %vm81_vm13 = vcmask 261312  }
   0xb   :  { %vm87_vm14 = vcmask 195712   ;;  %vm93_vm15 = vcmask 130112  }
   0xe   :  { %43 = vrot.lane.b32.xlu0 %v107_v7, %s137_s30  ;;  %49 = vrot.lane.b32.xlu1 %v108_v8, %s138_s2 }
  0x12   :  { %55 = vrot.lane.b32.xlu0 %v109_v9, %s139_s7  ;;  %61 = vrot.lane.b32.xlu1 %v110_v10, %s140_s8 }
  0x16   :  { %67 = vrot.lane.b32.xlu0 %v111_v11, %s141_s13  ;;  %73 = vrot.lane.b32.xlu1 %v112_v12, %s142_s14 }
  0x1a   :  { %79 = vrot.lane.b32.xlu0 %v113_v13, %s143_s19  ;;  %85 = vrot.lane.b32.xlu1 %v114_v14, %s144_s20 }
  0x1e   :  { %91 = vrot.lane.b32.xlu0 %v115_v15, %s145_s0 }
  0x74   :  { %v8_v16 = vpop.permute.xlu0 %7   ;;  %v20_v17 = vpop.permute.xlu1 %19  }
  0x75   :  { %10 = vst.msk [vmem:[#allocation0] sm:$0x1] %vm9_vm1, %v8_v16  }
  0x78   :  { %v14_v18 = vpop.permute.xlu0 %13   ;;  %v26_v19 = vpop.permute.xlu1 %25  }
  0x79   :  { %16 = vst.msk [vmem:[#allocation0] sm:$0x1] %vm15_vm2, %v14_v18  }
  0x7a   :  { %22 = vst.msk [vmem:[#allocation0] sm:$0x1] %vm21_vm3, %v20_v17  }
  0x7b   :  { %28 = vst.msk [vmem:[#allocation0] sm:$0x1] %vm27_vm4, %v26_v19  }
  0x7c   :  { %v32_v20 = vpop.permute.xlu0 %31   ;;  %v38_v21 = vpop.permute.xlu1 %37  }
  0x7d   :  { %34 = vst.msk [vmem:[#allocation0] sm:$0x1] %vm33_vm5, %v32_v20  }
  0x7e   :  { %40 = vst.msk [vmem:[#allocation0] sm:$0x1] %vm39_vm6, %v38_v21  }
  0x80   :  { %v44_v22 = vpop.permute.xlu0 %43   ;;  %v50_v23 = vpop.permute.xlu1 %49  }
  0x81   :  { %46 = vst.msk [vmem:[#allocation0] sm:$0x1] %vm45_vm7, %v44_v22  }
  0x82   :  { %52 = vst.msk [vmem:[#allocation0] sm:$0x1] %vm51_vm8, %v50_v23  }
  0x84   :  { %v56_v24 = vpop.permute.xlu0 %55   ;;  %v62_v25 = vpop.permute.xlu1 %61  }
  0x85   :  { %58 = vst.msk [vmem:[#allocation0] sm:$0x1] %vm57_vm9, %v56_v24  }
  0x86   :  { %64 = vst.msk [vmem:[#allocation0] sm:$0x1] %vm63_vm10, %v62_v25  }
  0x88   :  { %v68_v26 = vpop.permute.xlu0 %67   ;;  %v74_v27 = vpop.permute.xlu1 %73  }
  0x89   :  { %70 = vst.msk [vmem:[#allocation0] sm:$0x1] %vm69_vm11, %v68_v26  }
  0x8a   :  { %76 = vst.msk [vmem:[#allocation0] sm:$0x1] %vm75_vm12, %v74_v27  }
  0x8c   :  { %v80_v28 = vpop.permute.xlu0 %79   ;;  %v86_v29 = vpop.permute.xlu1 %85  }
  0x8d   :  { %82 = vst.msk [vmem:[#allocation0] sm:$0x1] %vm81_vm13, %v80_v28  }
  0x8e   :  { %88 = vst.msk [vmem:[#allocation0] sm:$0x1] %vm87_vm14, %v86_v29  }
  0x90   :  { %v92_v30 = vpop.permute.xlu0 %91  }
  0x91   :  { %94 = vst.msk [vmem:[#allocation0] sm:$0x1] %vm93_vm15, %v92_v30  }
  0x98   :  { %v98_v31 = vld [vmem:[#allocation0] sm:$0x1] }
  0x99   :  { %100 = vst [vmem:[%s208_s1] sm:$0x1] %v98_v31 }

// kernel: _resblock_nchw_jit.1
= control target key start
LH: loop header
LB: loop body
LE: loop exit
PB: predicated region body
PF: predicated region fallthrough
CT: control target
= control target key end

     0   :  { %v1891_v0 = vmov 0.0|0.0   ;;  %vm1892_vm0 = vmmov 0   ;;  %v1893_v4 = vmov 0.0   ;;  %v131_v40 = vlaneseq  ;;  %s2317_s7 = inlined_call_operand.vmem [shape: f32[128,128], index: 7, kind: input, shape index: {}]   ;;  %s2318_s0 = inlined_call_operand.vmem [shape: f32[2,16,128], index: 0, kind: input, shape index: {}, may-alias: {0,8}]   ;;  %s2319_s1 = inlined_call_operand.vmem [shape: bf16[3,128,128], index: 1, kind: input, shape index: {}]   ;;  %s2320_s2 = inlined_call_operand.vmem [shape: f32[1,128], index: 2, kind: input, shape index: {}]   ;;  %s2321_s3 = inlined_call_operand.vmem [shape: f32[1,128], index: 3, kind: input, shape index: {}]   ;;  %s2322_s4 = inlined_call_operand.vmem [shape: bf16[3,128,128], index: 4, kind: input, shape index: {}]   ;;  %s2323_s5 = inlined_call_operand.vmem [shape: f32[1,128], index: 5, kind: input, shape index: {}]   ;;  %s2324_s6 = inlined_call_operand.vmem [shape: f32[1,128], index: 6, kind: input, shape index: {}]   ;;  %s2325_s8 = inlined_call_operand.vmem [shape: f32[2,16,128], index: 8, kind: output, shape index: {}, may-alias: {0,8}]  }
   0x1   :  { %1724 = vmatprep.subr.bf16.mxu0 %v1891_v0  ;;  %v34_v1 = vld [vmem:[%s2317_s7] sm:$0xff]  ;;  %v35_v2 = vld [vmem:[%s2317_s7 + $0x8] sm:$0xff]  ;;  %v36_v3 = vld [vmem:[%s2317_s7 + $0x10] sm:$0xff]  ;;  %1496 = vmatprep.mubr.msk.f32.mxu0 %vm1892_vm0, %v1893_v4  ;;  %vm254_vm1 = vcmask 1040384   ;;  %vm269_vm2 = vcmask 1046528  }
   0x2   :  { %v1951_v5 = vpack.c.bf16 %v35_v2, %v34_v1  ;;  %v37_v6 = vld [vmem:[%s2317_s7 + $0x18] sm:$0xff]  ;;  %1772 = vmatprep.subr.bf16.mxu1 %v1891_v0  ;;  %1626 = vmatprep.mubr.msk.f32.mxu1 %vm1892_vm0, %v1893_v4  ;;  %v38_v8 = vld [vmem:[%s2317_s7 + $0x20] sm:$0xff]  ;;  %v39_v9 = vld [vmem:[%s2317_s7 + $0x28] sm:$0xff]  ;;  %v132_v41 = vshrl.u32 %v131_v40, 7 }
   0x3   :  { %v1960_v7 = vpack.c.bf16 %v37_v6, %v36_v3  ;;  %v1974_v10 = vld [vmem:[%s2318_s0] sm:$0xff]  ;;  %v1979_v11 = vld [vmem:[%s2318_s0 + $0x8] sm:$0xff]  ;;  %v1984_v12 = vld [vmem:[%s2318_s0 + $0x10] sm:$0xff]  ;;  %v1989_v14 = vpack.c.bf16 %v39_v9, %v38_v8 }
   0x4   :  { %1726 = vmatpush3.bf16.msra.mxu0 %v1951_v5  ;;  %1774 = vmatpush3.bf16.msra.mxu1 %v1951_v5  ;;  %v52_v13 = vadd.f32 %v1979_v11, %v1974_v10  ;;  %v1994_v15 = vld [vmem:[%s2318_s0 + $0x18] sm:$0xff]  ;;  %v40_v16 = vld [vmem:[%s2317_s7 + $0x30] sm:$0xff]  ;;  %v42_v21 = vld [vmem:[%s2317_s7 + $0x40] sm:$0xff]  ;;  %v2085_v42 = vsub.s32 0, %v132_v41 }
   0x5   :  { %1727 = vmatprep.subr.bf16.mxu0 %v1891_v0  ;;  %1775 = vmatprep.subr.bf16.mxu1 %v1891_v0  ;;  %v41_v17 = vld [vmem:[%s2317_s7 + $0x38] sm:$0xff]  ;;  %v43_v22 = vld [vmem:[%s2317_s7 + $0x48] sm:$0xff]  ;;  %v44_v26 = vld [vmem:[%s2317_s7 + $0x50] sm:$0xff] }
   0x6   :  { %v53_v18 = vadd.f32 %v52_v13, %v1984_v12  ;;  %v2008_v20 = vpack.c.bf16 %v41_v17, %v40_v16  ;;  %v2020_v25 = vpack.c.bf16 %v43_v22, %v42_v21  ;;  %v45_v27 = vld [vmem:[%s2317_s7 + $0x58] sm:$0xff]  ;;  %v46_v30 = vld [vmem:[%s2317_s7 + $0x60] sm:$0xff]  ;;  %v47_v31 = vld [vmem:[%s2317_s7 + $0x68] sm:$0xff] }
   0x7   :  { %v2032_v29 = vpack.c.bf16 %v45_v27, %v44_v26  ;;  %v2044_v33 = vpack.c.bf16 %v47_v31, %v46_v30  ;;  %v48_v34 = vld [vmem:[%s2317_s7 + $0x70] sm:$0xff]  ;;  %v49_v35 = vld [vmem:[%s2317_s7 + $0x78] sm:$0xff]  ;;  %v1839_v39 = vld [vmem:[%s2319_s1 + $0x40] sm:$0xff]  }
   0x8   :  { %1729 = vmatpush3.bf16.msra.mxu0 %v1960_v7  ;;  %1777 = vmatpush3.bf16.msra.mxu1 %v1960_v7  ;;  %v54_v19 = vadd.f32 %v53_v18, %v1994_v15  ;;  %v2056_v37 = vpack.c.bf16 %v49_v35, %v48_v34  ;;  %v1840_v63 = vld [vmem:[%s2319_s1 + $0x48] sm:$0xff]   ;;  %v1841_v1 = vld [vmem:[%s2319_s1 + $0x50] sm:$0xff]   ;;  %v1842_v2 = vld [vmem:[%s2319_s1 + $0x58] sm:$0xff]  }
   0x9   :  { %1730 = vmatprep.subr.bf16.mxu0 %v1891_v0  ;;  %1778 = vmatprep.subr.bf16.mxu1 %v1891_v0  ;;  %v1843_v3 = vld [vmem:[%s2319_s1 + $0x60] sm:$0xff]   ;;  %v1844_v6 = vld [vmem:[%s2319_s1 + $0x68] sm:$0xff]   ;;  %v1845_v8 = vld [vmem:[%s2319_s1 + $0x70] sm:$0xff]  }
   0xa   :  { %v55_v23 = vrot.slane %v54_v19, 4  ;;  %v1846_v9 = vld [vmem:[%s2319_s1 + $0x78] sm:$0xff]   ;;  %v1847_v13 = vld [vmem:[%s2319_s1] sm:$0xff]  }
   0xc   :  { %1732 = vmatpush3.bf16.msra.mxu0 %v1989_v14  ;;  %1780 = vmatpush3.bf16.msra.mxu1 %v1989_v14  ;;  %v56_v24 = vadd.f32 %v55_v23, %v54_v19  ;;  %v50_v19 = vld [vmem:[%s2320_s2] sm:$0x1] }
   0xd   :  { %1733 = vmatprep.subr.bf16.mxu0 %v1891_v0  ;;  %1781 = vmatprep.subr.bf16.mxu1 %v1891_v0 }
   0xe   :  { %v57_v28 = vrot.slane %v56_v24, 2 }
  0x10   :  { %1735 = vmatpush3.bf16.msra.mxu0 %v2008_v20  ;;  %1783 = vmatpush3.bf16.msra.mxu1 %v2008_v20  ;;  %v58_v32 = vadd.f32 %v57_v28, %v56_v24  ;;  %v1222_v24 = vld [vmem:[%s2321_s3] ss:$0 sm:$0xff] }
  0x11   :  { %1736 = vmatprep.subr.bf16.mxu0 %v1891_v0  ;;  %1784 = vmatprep.subr.bf16.mxu1 %v1891_v0 }
  0x12   :  { %v59_v36 = vrot.slane %v58_v32, 1 }
  0x14   :  { %1738 = vmatpush3.bf16.msra.mxu0 %v2020_v25  ;;  %1786 = vmatpush3.bf16.msra.mxu1 %v2020_v25  ;;  %v60_v38 = vadd.f32 %v59_v36, %v58_v32 }
  0x15   :  { %1739 = vmatprep.subr.bf16.mxu0 %v1891_v0  ;;  %1787 = vmatprep.subr.bf16.mxu1 %v1891_v0 }
  0x18   :  { %1741 = vmatpush3.bf16.msra.mxu0 %v2032_v29  ;;  %1789 = vmatpush3.bf16.msra.mxu1 %v2032_v29 }
  0x19   :  { %1742 = vmatprep.subr.bf16.mxu0 %v1891_v0  ;;  %1790 = vmatprep.subr.bf16.mxu1 %v1891_v0 }
  0x1c   :  { %1744 = vmatpush3.bf16.msra.mxu0 %v2044_v33  ;;  %1792 = vmatpush3.bf16.msra.mxu1 %v2044_v33 }
  0x1d   :  { %1745 = vmatprep.subr.bf16.mxu0 %v1891_v0  ;;  %1793 = vmatprep.subr.bf16.mxu1 %v1891_v0 }
  0x20   :  { %1747 = vmatpush3.bf16.msra.mxu0 %v2056_v37  ;;  %1795 = vmatpush3.bf16.msra.mxu1 %v2056_v37 }
  0x21   :  { %1748 = vmatprep.subr.bf16.mxu0 %v1891_v0  ;;  %1796 = vmatprep.subr.bf16.mxu1 %v1891_v0 }
  0x23   :  { %1497 = vmatmul.mubr.f32.vlgmr.msra.gmra.mrb[0].mxu0 %v60_v38 }
  0x24   :  { %1750 = vmatpush3.bf16.msra.mxu0 %v1951_v5  ;;  %1531 = vmatprep.mubr.msk.f32.mxu0 %vm1892_vm0, %v1893_v4 }
  0x25   :  { %1751 = vmatprep.subr.bf16.mxu0 %v1891_v0 }
  0x28   :  { %1753 = vmatpush3.bf16.msra.mxu0 %v1960_v7 }
  0x29   :  { %1754 = vmatprep.subr.bf16.mxu0 %v1891_v0 }
  0x2c   :  { %1756 = vmatpush3.bf16.msra.mxu0 %v1989_v14 }
  0x2d   :  { %1757 = vmatprep.subr.bf16.mxu0 %v1891_v0 }
  0x30   :  { %1759 = vmatpush3.bf16.msra.mxu0 %v2008_v20 }
  0x31   :  { %1760 = vmatprep.subr.bf16.mxu0 %v1891_v0 }
  0x34   :  { %1762 = vmatpush3.bf16.msra.mxu0 %v2020_v25 }
  0x35   :  { %1763 = vmatprep.subr.bf16.mxu0 %v1891_v0 }
  0x38   :  { %1765 = vmatpush3.bf16.msra.mxu0 %v2032_v29 }
  0x39   :  { %1766 = vmatprep.subr.bf16.mxu0 %v1891_v0 }
  0x3c   :  { %1768 = vmatpush3.bf16.msra.mxu0 %v2044_v33 }
  0x3d   :  { %1769 = vmatprep.subr.bf16.mxu0 %v1891_v0 }
  0x40   :  { %1771 = vmatpush3.bf16.msra.mxu0 %v2056_v37 }
  0x41   :  { %1534 = vmatprep.subr.bf16.mxu0 %v1839_v39 }
  0xf6   :  { %v127_v43 = vpop.f32.mrb[0].mxu0 }
  0xf7   :  { %v134_v44 = vrot.slane %v127_v43, %v2085_v42  ;;  %v1498_v45 = vpop.f32.mrb[1].mxu0 }
  0xf9   :  { %v135_v46 = vsub.f32 %v1974_v10, %v134_v44  ;;  %v136_v47 = vsub.f32 %v1979_v11, %v134_v44  ;;  %v137_v48 = vsub.f32 %v1984_v12, %v134_v44  ;;  %v138_v49 = vsub.f32 %v1994_v15, %v134_v44 }
  0xfb   :  { %v139_v50 = vmul.f32 %v135_v46, %v135_v46  ;;  %v140_v51 = vmul.f32 %v136_v47, %v136_v47  ;;  %v141_v52 = vmul.f32 %v137_v48, %v137_v48  ;;  %v142_v54 = vmul.f32 %v138_v49, %v138_v49 }
  0xfd   :  { %v143_v53 = vadd.f32 %v140_v51, %v139_v50  ;;  %v1849_v50 = vld [vmem:[%s2319_s1 + $0x10] sm:$0xff]   ;;  %v1850_v51 = vld [vmem:[%s2319_s1 + $0x18] sm:$0xff]  }
  0xff   :  { %v144_v55 = vadd.f32 %v143_v53, %v141_v52  ;;  %v1851_v52 = vld [vmem:[%s2319_s1 + $0x20] sm:$0xff]   ;;  %v1852_v53 = vld [vmem:[%s2319_s1 + $0x28] sm:$0xff]  }
 0x101   :  { %v145_v56 = vadd.f32 %v144_v55, %v142_v54  ;;  %v1853_v54 = vld [vmem:[%s2319_s1 + $0x30] sm:$0xff]   ;;  %v1854_v55 = vld [vmem:[%s2319_s1 + $0x38] sm:$0xff]  }
 0x103   :  { %v146_v57 = vrot.slane %v145_v56, 4 }
 0x105   :  { %v147_v58 = vadd.f32 %v146_v57, %v145_v56 }
 0x107   :  { %v148_v59 = vrot.slane %v147_v58, 2 }
 0x109   :  { %v149_v60 = vadd.f32 %v148_v59, %v147_v58 }
 0x10b   :  { %v150_v61 = vrot.slane %v149_v60, 1 }
 0x10d   :  { %v151_v62 = vadd.f32 %v150_v61, %v149_v60  ;;  %v1855_v60 = vld [vmem:[%s2319_s1 + $0x80] sm:$0xff]  }
 0x10f   :  { %1532 = vmatmul.mubr.f32.vlgmr.msra.gmra.mrb[2].mxu0 %v151_v62 }
 0x110   :  { %1535 = vmatpush3.bf16.msra.mxu0 %v1839_v39 }
 0x111   :  { %1536 = vmatprep.subr.bf16.mxu0 %v1840_v63 }
 0x114   :  { %1537 = vmatpush3.bf16.msra.mxu0 %v1840_v63 }
 0x115   :  { %1538 = vmatprep.subr.bf16.mxu0 %v1841_v1 }
 0x118   :  { %1539 = vmatpush3.bf16.msra.mxu0 %v1841_v1 }
 0x119   :  { %1540 = vmatprep.subr.bf16.mxu0 %v1842_v2 }
 0x11c   :  { %1541 = vmatpush3.bf16.msra.mxu0 %v1842_v2 }
 0x11d   :  { %1542 = vmatprep.subr.bf16.mxu0 %v1843_v3 }
 0x120   :  { %1543 = vmatpush3.bf16.msra.mxu0 %v1843_v3  ;;  %v1856_v3 = vld [vmem:[%s2319_s1 + $0x88] sm:$0xff]  }
 0x121   :  { %1544 = vmatprep.subr.bf16.mxu0 %v1844_v6 }
 0x124   :  { %1545 = vmatpush3.bf16.msra.mxu0 %v1844_v6 }
 0x125   :  { %1546 = vmatprep.subr.bf16.mxu0 %v1845_v8 }
 0x128   :  { %1547 = vmatpush3.bf16.msra.mxu0 %v1845_v8  ;;  %v1857_v8 = vld [vmem:[%s2319_s1 + $0x90] sm:$0xff]  }
 0x129   :  { %1548 = vmatprep.subr.bf16.mxu0 %v1846_v9 }
 0x12c   :  { %1549 = vmatpush3.bf16.msra.mxu0 %v1846_v9  ;;  %v1858_v9 = vld [vmem:[%s2319_s1 + $0x98] sm:$0xff]  }
 0x12d   :  { %1554 = vmatprep.subr.bf16.mxu0 %v1847_v13 }
 0x1e2   :  { %v218_v16 = vpop.f32.mrb[2].mxu0 }
 0x1e3   :  { %v219_v17 = vadd.f32 1e-05, %v218_v16  ;;  %v1533_v18 = vpop.f32.mrb[3].mxu0  ;;  %v1860_v16 = vld [vmem:[%s2319_s1 + $0xa8] sm:$0xff]  }
 0x1e4   :  { %v1862_v18 = vld [vmem:[%s2319_s1 + $0xb8] sm:$0xff]  }
 0x1e5   :  { %1887 = vrsqrt.f32 %v219_v17  ;;  %v1861_v17 = vld [vmem:[%s2319_s1 + $0xb0] sm:$0xff]  }
 0x1ef   :  { %v1888_v21 = vpop.eup %1887 }
 0x1f0   :  { %v223_v22 = vmul.f32 %v1888_v21, %v50_v19 }
 0x1f2   :  { %v227_v23 = vrot.slane %v223_v22, %v2085_v42 }
 0x1f4   :  { %v228_v26 = vmul.f32 %v227_v23, %v135_v46  ;;  %v229_v27 = vmul.f32 %v227_v23, %v136_v47  ;;  %v230_v28 = vmul.f32 %v227_v23, %v137_v48  ;;  %v231_v30 = vmul.f32 %v227_v23, %v138_v49  ;;  %v1848_v46 = vld [vmem:[%s2319_s1 + $0x8] sm:$0xff]  }
 0x1f6   :  { %v238_v31 = vadd.f32 %v1222_v24, %v228_v26  ;;  %v239_v32 = vadd.f32 %v1222_v24, %v229_v27  ;;  %v240_v34 = vadd.f32 %v1222_v24, %v230_v28  ;;  %v241_v35 = vadd.f32 %v1222_v24, %v231_v30 }
 0x1f8   :  { %v242_v36 = vmax.f32 %v238_v31, 0.0  ;;  %v243_v38 = vmax.f32 %v239_v32, 0.0  ;;  %v2123_v39 = vmax.f32 %v240_v34, 0.0  ;;  %v2125_v40 = vmax.f32 %v241_v35, 0.0 }
 0x1fa   :  { %v267_v41 = vpack.c.bf16 %v243_v38, %v242_v36  ;;  %v268_v43 = vpack.c.bf16 %v2125_v40, %v2123_v39  ;;  %v248_v44 = vrot.slane %v243_v38, 7  ;;  %v255_v45 = vrot.slane %v242_v36, 7 }
 0x1fb   :  { %v249_v56 = vrot.slane %v2125_v40, 7  ;;  %v257_v57 = vrot.slane %v2123_v39, 7  ;;  %v270_v58 = vrot.slane %v242_v36, 1  ;;  %v271_v59 = vrot.slane %v243_v38, 1 }
 0x1fc   :  { %1550 = vmatprep.mubr.bf16.mxu0 %v267_v41  ;;  %v256_v47 = vsel %vm254_vm1, %v255_v45, %v248_v44  ;;  %v263_v48 = vsel %vm254_vm1, %v248_v44, %v255_v45  ;;  %v273_v19 = vrot.slane %v2123_v39, 1  ;;  %v274_v21 = vrot.slane %v2125_v40, 1 }
 0x1fd   :  { %1551 = vmatmul.mubr.bf16.vlgmr.msra.gmra.mrb[4].mxu0 %v268_v43  ;;  %v265_v49 = vpack.c.bf16 %v256_v47, %v263_v48  ;;  %v258_v61 = vsel %vm254_vm1, %v257_v57, %v249_v56  ;;  %v264_v62 = vsel %vm254_vm1, %v249_v56, %v257_v57  ;;  %v272_v63 = vsel %vm269_vm2, %v270_v58, %v271_v59  ;;  %v1866_v56 = vld [vmem:[%s2322_s4 + $0x58] sm:$0xff]   ;;  %v1867_v57 = vld [vmem:[%s2322_s4 + $0x60] sm:$0xff]  }
 0x1fe   :  { %1555 = vmatpush3.bf16.msra.mxu0 %v1847_v13  ;;  %v282_v1 = vsel %vm269_vm2, %v271_v59, %v270_v58  ;;  %v266_v2 = vpack.c.bf16 %v258_v61, %v264_v62  ;;  %v1859_v13 = vld [vmem:[%s2319_s1 + $0xa0] sm:$0xff]   ;;  %v275_v22 = vsel %vm269_vm2, %v273_v19, %v274_v21  ;;  %v283_v23 = vsel %vm269_vm2, %v274_v21, %v273_v19  ;;  %v1868_v58 = vld [vmem:[%s2322_s4 + $0x68] sm:$0xff]   ;;  %v1869_v59 = vld [vmem:[%s2322_s4 + $0x70] sm:$0xff]  }
 0x1ff   :  { %1570 = vmatprep.mubr.bf16.mxu0 %v265_v49  ;;  %1556 = vmatprep.subr.bf16.mxu0 %v1848_v46  ;;  %v284_v6 = vpack.c.bf16 %v282_v1, %v272_v63  ;;  %v285_v24 = vpack.c.bf16 %v283_v23, %v275_v22  ;;  %v1871_v61 = vld [vmem:[%s2322_s4] sm:$0xff]  }
 0x202   :  { %1557 = vmatpush3.bf16.msra.mxu0 %v1848_v46 }
 0x203   :  { %1558 = vmatprep.subr.bf16.mxu0 %v1849_v50 }
 0x206   :  { %1559 = vmatpush3.bf16.msra.mxu0 %v1849_v50 }
 0x207   :  { %1560 = vmatprep.subr.bf16.mxu0 %v1850_v51 }
 0x20a   :  { %1561 = vmatpush3.bf16.msra.mxu0 %v1850_v51 }
 0x20b   :  { %1562 = vmatprep.subr.bf16.mxu0 %v1851_v52 }
 0x20e   :  { %1563 = vmatpush3.bf16.msra.mxu0 %v1851_v52 }
 0x20f   :  { %1564 = vmatprep.subr.bf16.mxu0 %v1852_v53 }
 0x212   :  { %1565 = vmatpush3.bf16.msra.mxu0 %v1852_v53 }
 0x213   :  { %1566 = vmatprep.subr.bf16.mxu0 %v1853_v54 }
 0x216   :  { %1567 = vmatpush3.bf16.msra.mxu0 %v1853_v54  ;;  %v1864_v54 = vld [vmem:[%s2322_s4 + $0x48] sm:$0xff]  }
 0x217   :  { %1568 = vmatprep.subr.bf16.mxu0 %v1854_v55 }
 0x21a   :  { %1569 = vmatpush3.bf16.msra.mxu0 %v1854_v55  ;;  %v1865_v55 = vld [vmem:[%s2322_s4 + $0x50] sm:$0xff]  }
 0x21b   :  { %1574 = vmatprep.subr.bf16.mxu0 %v1855_v60 }
 0x21d   :  { %1571 = vmatmul.mubr.bf16.vlgmr.msra.gmra.mrb[4].mxu0 %v266_v2  ;;  %v631_v2 = vld [vmem:[%s2323_s5] sm:$0x1] }
 0x21e   :  { %1575 = vmatpush3.bf16.msra.mxu0 %v1855_v60  ;;  %1590 = vmatprep.mubr.bf16.mxu0 %v284_v6  ;;  %v1870_v60 = vld [vmem:[%s2322_s4 + $0x78] sm:$0xff]  }
 0x21f   :  { %1576 = vmatprep.subr.bf16.mxu0 %v1856_v3 }
 0x222   :  { %1577 = vmatpush3.bf16.msra.mxu0 %v1856_v3 }
 0x223   :  { %1578 = vmatprep.subr.bf16.mxu0 %v1857_v8 }
 0x226   :  { %1579 = vmatpush3.bf16.msra.mxu0 %v1857_v8 }
 0x227   :  { %1580 = vmatprep.subr.bf16.mxu0 %v1858_v9 }
 0x22a   :  { %1581 = vmatpush3.bf16.msra.mxu0 %v1858_v9  ;;  %v1279_v9 = vld [vmem:[%s2324_s6] ss:$0 sm:$0xff] }
 0x22b   :  { %1582 = vmatprep.subr.bf16.mxu0 %v1859_v13 }
 0x22e   :  { %1583 = vmatpush3.bf16.msra.mxu0 %v1859_v13 }
 0x22f   :  { %1584 = vmatprep.subr.bf16.mxu0 %v1860_v16 }
 0x232   :  { %1585 = vmatpush3.bf16.msra.mxu0 %v1860_v16 }
 0x233   :  { %1586 = vmatprep.subr.bf16.mxu0 %v1861_v17 }
 0x236   :  { %1587 = vmatpush3.bf16.msra.mxu0 %v1861_v17 }
 0x237   :  { %1588 = vmatprep.subr.bf16.mxu0 %v1862_v18 }
 0x23a   :  { %1589 = vmatpush3.bf16.msra.mxu0 %v1862_v18 }
 0x23d   :  { %1591 = vmatmul.mubr.bf16.vlgmr.msra.gmra.mrb[4].mxu0 %v285_v24 }
 0x310   :  { %v1592_v26 = vpop.f32.mrb[4].mxu0 }
 0x311   :  { %v612_v27 = vpop.f32.mrb[5].mxu0 }
 0x312   :  { %v1593_v28 = vpop.f32.mrb[6].mxu0 }
 0x313   :  { %v615_v30 = vpop.f32.mrb[7].mxu0 }
 0x314   :  { %v633_v31 = vadd.f32 %v615_v30, %v612_v27 }
 0x316   :  { %v634_v32 = vadd.f32 %v1592_v26, %v633_v31 }
 0x318   :  { %v635_v34 = vadd.f32 %v1593_v28, %v634_v32 }
 0x31a   :  { %v636_v35 = vrot.slane %v635_v34, 4 }
 0x31c   :  { %v637_v36 = vadd.f32 %v636_v35, %v635_v34  ;;  %v1872_v34 = vld [vmem:[%s2322_s4 + $0x8] sm:$0xff]  }
 0x31e   :  { %v638_v38 = vrot.slane %v637_v36, 2 }
 0x320   :  { %v639_v39 = vadd.f32 %v638_v38, %v637_v36 }
 0x322   :  { %v640_v40 = vrot.slane %v639_v39, 1 }
 0x324   :  { %v641_v41 = vadd.f32 %v640_v40, %v639_v39  ;;  %v1873_v39 = vld [vmem:[%s2322_s4 + $0x10] sm:$0xff]   ;;  %v1874_v40 = vld [vmem:[%s2322_s4 + $0x18] sm:$0xff]  }
 0x326   :  { %1627 = vmatmul.mubr.f32.vlgmr.msra.gmra.mrb[0].mxu1 %v641_v41  ;;  %v1875_v41 = vld [vmem:[%s2322_s4 + $0x20] sm:$0xff]  }
 0x327   :  { %1798 = vmatpush3.bf16.msra.mxu1 %v1951_v5  ;;  %1661 = vmatprep.mubr.msk.f32.mxu1 %vm1892_vm0, %v1893_v4  ;;  %v1863_v4 = vld [vmem:[%s2322_s4 + $0x40] sm:$0xff]  }
 0x328   :  { %1799 = vmatprep.subr.bf16.mxu1 %v1891_v0 }
 0x32b   :  { %1801 = vmatpush3.bf16.msra.mxu1 %v1960_v7 }
 0x32c   :  { %1802 = vmatprep.subr.bf16.mxu1 %v1891_v0 }
 0x32f   :  { %1804 = vmatpush3.bf16.msra.mxu1 %v1989_v14 }
 0x330   :  { %1805 = vmatprep.subr.bf16.mxu1 %v1891_v0 }
 0x333   :  { %1807 = vmatpush3.bf16.msra.mxu1 %v2008_v20 }
 0x334   :  { %1808 = vmatprep.subr.bf16.mxu1 %v1891_v0 }
 0x337   :  { %1810 = vmatpush3.bf16.msra.mxu1 %v2020_v25 }
 0x338   :  { %1811 = vmatprep.subr.bf16.mxu1 %v1891_v0 }
 0x33b   :  { %1813 = vmatpush3.bf16.msra.mxu1 %v2032_v29 }
 0x33c   :  { %1814 = vmatprep.subr.bf16.mxu1 %v1891_v0 }
 0x33f   :  { %1816 = vmatpush3.bf16.msra.mxu1 %v2044_v33 }
 0x340   :  { %1817 = vmatprep.subr.bf16.mxu1 %v1891_v0 }
 0x343   :  { %1819 = vmatpush3.bf16.msra.mxu1 %v2056_v37 }
 0x344   :  { %1664 = vmatprep.subr.bf16.mxu1 %v1863_v4 }
 0x3f9   :  { %v708_v5 = vpop.f32.mrb[0].mxu1 }
 0x3fa   :  { %v715_v7 = vrot.slane %v708_v5, %v2085_v42  ;;  %v1628_v14 = vpop.f32.mrb[1].mxu1  ;;  %v1877_v5 = vld [vmem:[%s2322_s4 + $0x30] sm:$0xff]  }
 0x3fc   :  { %v716_v20 = vsub.f32 %v612_v27, %v715_v7  ;;  %v717_v25 = vsub.f32 %v615_v30, %v715_v7  ;;  %v718_v29 = vsub.f32 %v1592_v26, %v715_v7  ;;  %v719_v43 = vsub.f32 %v1593_v28, %v715_v7  ;;  %v1878_v7 = vld [vmem:[%s2322_s4 + $0x38] sm:$0xff]  }
 0x3fe   :  { %v720_v44 = vmul.f32 %v716_v20, %v716_v20  ;;  %v721_v45 = vmul.f32 %v717_v25, %v717_v25  ;;  %v722_v33 = vmul.f32 %v718_v29, %v718_v29  ;;  %v723_v0 = vmul.f32 %v719_v43, %v719_v43 }
 0x400   :  { %v724_v46 = vadd.f32 %v721_v45, %v720_v44 }
 0x402   :  { %v725_v47 = vadd.f32 %v724_v46, %v722_v33 }
 0x404   :  { %v726_v37 = vadd.f32 %v725_v47, %v723_v0  ;;  %v1880_v47 = vld [vmem:[%s2322_s4 + $0x88] sm:$0xff]  }
 0x406   :  { %v727_v48 = vrot.slane %v726_v37, 4 }
 0x408   :  { %v728_v49 = vadd.f32 %v727_v48, %v726_v37  ;;  %v1881_v48 = vld [vmem:[%s2322_s4 + $0x90] sm:$0xff]  }
 0x40a   :  { %v729_v50 = vrot.slane %v728_v49, 2 }
 0x40c   :  { %v730_v51 = vadd.f32 %v729_v50, %v728_v49  ;;  %v1882_v49 = vld [vmem:[%s2322_s4 + $0x98] sm:$0xff]   ;;  %v1883_v50 = vld [vmem:[%s2322_s4 + $0xa0] sm:$0xff]  }
 0x40e   :  { %v731_v52 = vrot.slane %v730_v51, 1 }
 0x410   :  { %v732_v53 = vadd.f32 %v731_v52, %v730_v51  ;;  %v1884_v51 = vld [vmem:[%s2322_s4 + $0xa8] sm:$0xff]   ;;  %v1885_v52 = vld [vmem:[%s2322_s4 + $0xb0] sm:$0xff]  }
 0x412   :  { %1662 = vmatmul.mubr.f32.vlgmr.msra.gmra.mrb[2].mxu1 %v732_v53  ;;  %v1886_v53 = vld [vmem:[%s2322_s4 + $0xb8] sm:$0xff]  }
 0x413   :  { %1665 = vmatpush3.bf16.msra.mxu1 %v1863_v4  ;;  %v1876_v4 = vld [vmem:[%s2322_s4 + $0x28] sm:$0xff]  }
 0x414   :  { %1666 = vmatprep.subr.bf16.mxu1 %v1864_v54 }
 0x417   :  { %1667 = vmatpush3.bf16.msra.mxu1 %v1864_v54 }
 0x418   :  { %1668 = vmatprep.subr.bf16.mxu1 %v1865_v55 }
 0x41b   :  { %1669 = vmatpush3.bf16.msra.mxu1 %v1865_v55 }
 0x41c   :  { %1670 = vmatprep.subr.bf16.mxu1 %v1866_v56 }
 0x41f   :  { %1671 = vmatpush3.bf16.msra.mxu1 %v1866_v56 }
 0x420   :  { %1672 = vmatprep.subr.bf16.mxu1 %v1867_v57 }
 0x423   :  { %1673 = vmatpush3.bf16.msra.mxu1 %v1867_v57 }
 0x424   :  { %1674 = vmatprep.subr.bf16.mxu1 %v1868_v58 }
 0x427   :  { %1675 = vmatpush3.bf16.msra.mxu1 %v1868_v58 }
 0x428   :  { %1676 = vmatprep.subr.bf16.mxu1 %v1869_v59 }
 0x42b   :  { %1677 = vmatpush3.bf16.msra.mxu1 %v1869_v59 }
 0x42c   :  { %1678 = vmatprep.subr.bf16.mxu1 %v1870_v60 }
 0x42f   :  { %1679 = vmatpush3.bf16.msra.mxu1 %v1870_v60 }
 0x430   :  { %1684 = vmatprep.subr.bf16.mxu1 %v1871_v61 }
 0x4e5   :  { %v799_v62 = vpop.f32.mrb[2].mxu1 }
 0x4e6   :  { %v800_v63 = vadd.f32 1e-05, %v799_v62  ;;  %v1663_v1 = vpop.f32.mrb[3].mxu1 }
 0x4e8   :  { %1889 = vrsqrt.f32 %v800_v63 }
 0x4f2   :  { %v1890_v3 = vpop.eup %1889 }
 0x4f3   :  { %v804_v6 = vmul.f32 %v1890_v3, %v631_v2 }
 0x4f5   :  { %v808_v8 = vrot.slane %v804_v6, %v2085_v42 }
 0x4f7   :  { %v809_v13 = vmul.f32 %v808_v8, %v716_v20  ;;  %v810_v16 = vmul.f32 %v808_v8, %v717_v25  ;;  %v811_v17 = vmul.f32 %v808_v8, %v718_v29  ;;  %v812_v18 = vmul.f32 %v808_v8, %v719_v43  ;;  %v1879_v43 = vld [vmem:[%s2322_s4 + $0x80] sm:$0xff]  }
 0x4f9   :  { %v819_v19 = vadd.f32 %v1279_v9, %v809_v13  ;;  %v820_v21 = vadd.f32 %v1279_v9, %v810_v16  ;;  %v821_v22 = vadd.f32 %v1279_v9, %v811_v17  ;;  %v822_v23 = vadd.f32 %v1279_v9, %v812_v18 }
 0x4fb   :  { %v823_v24 = vmax.f32 %v819_v19, 0.0  ;;  %v824_v26 = vmax.f32 %v820_v21, 0.0  ;;  %v2238_v27 = vmax.f32 %v821_v22, 0.0  ;;  %v2240_v28 = vmax.f32 %v822_v23, 0.0 }
 0x4fd   :  { %v847_v30 = vpack.c.bf16 %v824_v26, %v823_v24  ;;  %v848_v42 = vpack.c.bf16 %v2240_v28, %v2238_v27  ;;  %v829_v31 = vrot.slane %v824_v26, 7  ;;  %v835_v32 = vrot.slane %v823_v24, 7 }
 0x4fe   :  { %v830_v14 = vrot.slane %v2240_v28, 7  ;;  %v837_v20 = vrot.slane %v2238_v27, 7  ;;  %v849_v25 = vrot.slane %v823_v24, 1  ;;  %v850_v29 = vrot.slane %v824_v26, 1 }
 0x4ff   :  { %1680 = vmatprep.mubr.bf16.mxu1 %v847_v30  ;;  %v836_v35 = vsel %vm254_vm1, %v835_v32, %v829_v31  ;;  %v843_v36 = vsel %vm254_vm1, %v829_v31, %v835_v32  ;;  %v852_v54 = vrot.slane %v2238_v27, 1  ;;  %v853_v55 = vrot.slane %v2240_v28, 1 }
 0x500   :  { %1681 = vmatmul.mubr.bf16.vlgmr.msra.gmra.mrb[4].mxu1 %v848_v42  ;;  %v845_v38 = vpack.c.bf16 %v836_v35, %v843_v36  ;;  %v838_v44 = vsel %vm254_vm1, %v837_v20, %v830_v14  ;;  %v844_v45 = vsel %vm254_vm1, %v830_v14, %v837_v20  ;;  %v851_v33 = vsel %vm269_vm2, %v849_v25, %v850_v29 }
 0x501   :  { %1685 = vmatpush3.bf16.msra.mxu1 %v1871_v61  ;;  %v861_v46 = vsel %vm269_vm2, %v850_v29, %v849_v25  ;;  %v846_v0 = vpack.c.bf16 %v838_v44, %v844_v45  ;;  %v854_v56 = vsel %vm269_vm2, %v852_v54, %v853_v55  ;;  %v862_v57 = vsel %vm269_vm2, %v853_v55, %v852_v54 }
 0x502   :  { %1700 = vmatprep.mubr.bf16.mxu1 %v845_v38  ;;  %1686 = vmatprep.subr.bf16.mxu1 %v1872_v34  ;;  %v863_v37 = vpack.c.bf16 %v861_v46, %v851_v33  ;;  %v864_v58 = vpack.c.bf16 %v862_v57, %v854_v56 }
 0x505   :  { %1687 = vmatpush3.bf16.msra.mxu1 %v1872_v34 }
 0x506   :  { %1688 = vmatprep.subr.bf16.mxu1 %v1873_v39 }
 0x509   :  { %1689 = vmatpush3.bf16.msra.mxu1 %v1873_v39 }
 0x50a   :  { %1690 = vmatprep.subr.bf16.mxu1 %v1874_v40 }
 0x50d   :  { %1691 = vmatpush3.bf16.msra.mxu1 %v1874_v40 }
 0x50e   :  { %1692 = vmatprep.subr.bf16.mxu1 %v1875_v41 }
 0x511   :  { %1693 = vmatpush3.bf16.msra.mxu1 %v1875_v41 }
 0x512   :  { %1694 = vmatprep.subr.bf16.mxu1 %v1876_v4 }
 0x515   :  { %1695 = vmatpush3.bf16.msra.mxu1 %v1876_v4 }
 0x516   :  { %1696 = vmatprep.subr.bf16.mxu1 %v1877_v5 }
 0x519   :  { %1697 = vmatpush3.bf16.msra.mxu1 %v1877_v5 }
 0x51a   :  { %1698 = vmatprep.subr.bf16.mxu1 %v1878_v7 }
 0x51d   :  { %1699 = vmatpush3.bf16.msra.mxu1 %v1878_v7 }
 0x51e   :  { %1704 = vmatprep.subr.bf16.mxu1 %v1879_v43 }
 0x520   :  { %1701 = vmatmul.mubr.bf16.vlgmr.msra.gmra.mrb[4].mxu1 %v846_v0 }
 0x521   :  { %1705 = vmatpush3.bf16.msra.mxu1 %v1879_v43  ;;  %1720 = vmatprep.mubr.bf16.mxu1 %v863_v37 }
 0x522   :  { %1706 = vmatprep.subr.bf16.mxu1 %v1880_v47 }
 0x525   :  { %1707 = vmatpush3.bf16.msra.mxu1 %v1880_v47 }
 0x526   :  { %1708 = vmatprep.subr.bf16.mxu1 %v1881_v48 }
 0x529   :  { %1709 = vmatpush3.bf16.msra.mxu1 %v1881_v48 }
 0x52a   :  { %1710 = vmatprep.subr.bf16.mxu1 %v1882_v49 }
 0x52d   :  { %1711 = vmatpush3.bf16.msra.mxu1 %v1882_v49 }
 0x52e   :  { %1712 = vmatprep.subr.bf16.mxu1 %v1883_v50 }
 0x531   :  { %1713 = vmatpush3.bf16.msra.mxu1 %v1883_v50 }
 0x532   :  { %1714 = vmatprep.subr.bf16.mxu1 %v1884_v51 }
 0x535   :  { %1715 = vmatpush3.bf16.msra.mxu1 %v1884_v51 }
 0x536   :  { %1716 = vmatprep.subr.bf16.mxu1 %v1885_v52 }
 0x539   :  { %1717 = vmatpush3.bf16.msra.mxu1 %v1885_v52 }
 0x53a   :  { %1718 = vmatprep.subr.bf16.mxu1 %v1886_v53 }
 0x53d   :  { %1719 = vmatpush3.bf16.msra.mxu1 %v1886_v53 }
 0x540   :  { %1721 = vmatmul.mubr.bf16.vlgmr.msra.gmra.mrb[4].mxu1 %v864_v58 }
 0x613   :  { %v1722_v59 = vpop.f32.mrb[4].mxu1 }
 0x614   :  { %v1212_v60 = vadd.f32 %v1722_v59, %v1984_v12  ;;  %v1191_v61 = vpop.f32.mrb[5].mxu1 }
 0x615   :  { %v1210_v62 = vadd.f32 %v1191_v61, %v1974_v10  ;;  %v1723_v63 = vpop.f32.mrb[6].mxu1 }
 0x616   :  { %1216 = vst [vmem:[%s2325_s8 + $0x10] sm:$0xff] %v1212_v60  ;;  %v1213_v1 = vadd.f32 %v1723_v63, %v1994_v15  ;;  %v1194_v2 = vpop.f32.mrb[7].mxu1 }
 0x617   :  { %1214 = vst [vmem:[%s2325_s8] sm:$0xff] %v1210_v62  ;;  %v1211_v3 = vadd.f32 %v1194_v2, %v1979_v11 }
 0x618   :  { %1217 = vst [vmem:[%s2325_s8 + $0x18] sm:$0xff] %v1213_v1 }
 0x619   :  { %1215 = vst [vmem:[%s2325_s8 + $0x8] sm:$0xff] %v1211_v3 }

</bundles_post_ra>
